<compile_context>
chip_gen: v6e
topology: v6e:2x2x1
jax: 0.10.0
libtpu: 0.0.40
codegen_flags: <defaults>
</compile_context>

<pallas_src>
import numpy as np
import jax
import jax.numpy as jnp
from jax.experimental import pallas as pl
from jax.experimental.pallas import tpu as pltpu


def make_kernel(k):
    """Same as training/utils.make_kernel, in numpy (float32, normalized)."""
    k = np.asarray(k, dtype=np.float32)
    if k.ndim == 1:
        k = k[None, :] * k[:, None]
    k = k / k.sum()
    return k


def _fir_toeplitz(taps, size_in, pad0, pad1, scale=1.0):
    """Banded matrix T (size_out, size_in) such that T @ v is the 1-D FIR of v
    with zero padding (pad0, pad1) folded in, matching upfirdn2d semantics
    (true convolution, i.e. flipped taps)."""
    taps = np.asarray(taps, dtype=np.float32)
    kt = taps.shape[0]
    size_out = size_in + pad0 + pad1 - kt + 1
    assert size_out > 0, "blur output size must be positive"
    t = np.zeros((size_out, size_in), dtype=np.float32)
    for i in range(size_out):
        for h in range(size_in):
            p = h - i + pad0
            if 0 <= p < kt:
                t[i, h] = taps[kt - 1 - p] * scale
    return t


def _tpu_limits():
    """(vmem_capacity_bytes, mxu_rows) for the local TPU, with safe fallbacks."""
    kind = ""
    try:
        kind = jax.devices()[0].device_kind.lower()
    except Exception:
        pass
    vmem = None
    try:
        info = pltpu.get_tpu_info()
        for attr in ("vmem_capacity_bytes", "vmem_bytes", "vmem_size_bytes"):
            v = getattr(info, attr, None)
            if isinstance(v, (int, np.integer)) and int(v) > 0:
                vmem = int(v)
                break
    except Exception:
        vmem = None
    if vmem is None:
        if "v7" in kind or "7x" in kind:
            vmem = 64 * 1024 * 1024          # v7x: 64 MiB per TensorCore
        elif kind:
            vmem = 128 * 1024 * 1024         # v5e / v6e: 128 MiB
        else:
            vmem = 64 * 1024 * 1024          # unknown: stay conservative
    # MXU systolic rows: 128 on v2-v5, 256 on v6e / v7x.
    mxu_rows = 128 if any(g in kind for g in ("v2", "v3", "v4", "v5")) else 256
    return vmem, mxu_rows


def _pick_planes_per_block(nplanes, H, W, Ho, Wo, in_item, out_item, tap_item,
                           cdt_item, budget_bytes, mxu_rows, max_unroll=32):
    """Planes per grid step: a divisor of nplanes that
      (a) leaves >= 2 grid steps so both v7x TensorCores get work,
      (b) keeps the double-buffered working set inside the VMEM budget,
      (c) keeps the per-plane vertical-FIR loop a short static unroll,
      (d) prefers an MXU-row-aligned fused M dimension (tb*H)."""
    if nplanes <= 1:
        return 1
    max_tb = max(1, min(nplanes // 2, max_unroll))
    cands = [t for t in range(1, max_tb + 1) if nplanes % t == 0] or [1]
    # Taps are grid-invariant but the pipeline still allocates two buffers each.
    taps_bytes = 2 * (W * Wo + Ho * H) * tap_item

    def working_set(t):
        act = 2 * t * (H * W * in_item + Ho * Wo * out_item)   # double-buffered in+out
        inter = t * H * Wo * max(cdt_item, 4)                   # f32 intermediate headroom
        return act + inter + taps_bytes

    fits = [t for t in cands if working_set(t) <= budget_bytes] or [1]
    best = max(fits)
    aligned = [t for t in fits if (t * H) % mxu_rows == 0]
    if aligned and 2 * max(aligned) >= best:                    # prefer MXU-aligned tb*H
        best = max(aligned)
    return best


def blur_pallas(x, taps, pad, upsample_factor=1, compute_dtype=None):
    """Forward pass of Blur: upfirdn2d(x, make_kernel(taps), pad=pad), NCHW."""
    k1 = np.asarray(taps, dtype=np.float32)
    if k1.ndim != 1:
        # TODO(synk): non-separable 2-D FIR taps would need a dense-tap fallback;
        # the Blur module always builds its kernel from 1-D taps.
        raise NotImplementedError("blur_pallas expects 1-D FIR taps")

    pad0, pad1 = pad
    N, C, H, W = map(int, x.shape)
    kt = int(k1.shape[0])
    Ho = H + pad0 + pad1 - kt + 1
    Wo = W + pad0 + pad1 - kt + 1
    assert Ho > 0 and Wo > 0

    # make_kernel divides outer(k1, k1) by (sum k1)^2; Blur scales by up^2.
    scale = float(upsample_factor) ** 2 / float(k1.sum()) ** 2

    if compute_dtype is None:
        # bf16 MXU operands (f32 accumulation) when the activation is already half
        # precision; keep f32 otherwise so results match the PyTorch module.
        if x.dtype == jnp.bfloat16 or x.dtype == jnp.float16:
            compute_dtype = jnp.bfloat16
        else:
            compute_dtype = jnp.float32
    cdt_item = np.dtype(compute_dtype).itemsize
    act_item = np.dtype(x.dtype).itemsize

    nplanes = N * C
    vmem_bytes, mxu_rows = _tpu_limits()
    budget = vmem_bytes // 2                    # tile budget; headroom for the 2-deep pipeline
    vmem_limit = int(vmem_bytes * 0.85)

    tb = _pick_planes_per_block(
        nplanes, H, W, Ho, Wo,
        in_item=act_item, out_item=act_item,
        tap_item=cdt_item, cdt_item=cdt_item,
        budget_bytes=budget, mxu_rows=mxu_rows)
    grid = (nplanes // tb,)

    # Zero padding + flipped taps folded into small banded Toeplitz matrices
    # (no jnp.pad pass; the activation makes exactly one HBM read and one write).
    bt_h = jnp.asarray(_fir_toeplitz(k1, W, pad0, pad1, scale=scale).T).astype(compute_dtype)  # (W, Wo)
    a_v = jnp.asarray(_fir_toeplitz(k1, H, pad0, pad1)).astype(compute_dtype)                  # (Ho, H)

    # When H is sublane-aligned, the horizontal FIR of all tb planes is fused into a
    # single MXU matmul with M = tb*H (2-D (tb*H, W) input block).  Otherwise fall back
    # to fully per-plane 3-D input blocks (no (8,128) constraint on tb either way).
    fuse_rows = (H % 8 == 0)

    def kernel_body(bt_ref, av_ref, x_ref, o_ref):
        bt = bt_ref[...]                                  # (W, Wo)  horizontal taps (+ norm)
        av = av_ref[...]                                  # (Ho, H)  vertical taps
        if fuse_rows:
            xv = x_ref[...].astype(compute_dtype)         # (tb*H, W), one hoisted cast
            # Horizontal 1-D FIR for all tb planes in one MXU matmul.
            th = jnp.dot(xv, bt, preferred_element_type=jnp.float32)   # (tb*H, Wo) f32
            th = th.astype(compute_dtype)
            for b in range(tb):                           # short static unroll (tb <= 32)
                th_b = th[b * H:(b + 1) * H, :]           # sublane-aligned static slice
                ob = jnp.dot(av, th_b, preferred_element_type=jnp.float32)  # (Ho, Wo) f32
                o_ref[b] = ob.astype(o_ref.dtype)
        else:
            for b in range(tb):                           # fully per-plane fallback
                xb = x_ref[b].astype(compute_dtype)       # (H, W)
                th = jnp.dot(xb, bt, preferred_element_type=jnp.float32).astype(compute_dtype)
                ob = jnp.dot(av, th, preferred_element_type=jnp.float32)
                o_ref[b] = ob.astype(o_ref.dtype)

    if fuse_rows:
        x_in = x.reshape(nplanes * H, W)                  # free metadata-only reshape
        x_spec = pl.BlockSpec((tb * H, W), lambda g: (g, 0))
    else:
        x_in = x.reshape(nplanes, H, W)                   # free metadata-only reshape
        x_spec = pl.BlockSpec((tb, H, W), lambda g: (g, 0, 0))

    # NOTE: taps have constant index_maps so they are DMA'd only once; with the
    # block-diagonal operand gone they are tiny, so the second pipeline buffer is
    # noise (counted in the budget above) and no pipeline_mode override is needed.
    # NOTE: output stays NCHW (Wo innermost); lane-dense relayout for Wo < 128 would
    # cost an extra full HBM transpose pass, so it is intentionally not done here.
    out3 = pl.pallas_call(
        kernel_body,
        out_shape=jax.ShapeDtypeStruct((nplanes, Ho, Wo), x.dtype),
        grid=grid,
        in_specs=[
            pl.BlockSpec((W, Wo), lambda g: (0, 0)),      # horizontal taps (grid-invariant)
            pl.BlockSpec((Ho, H), lambda g: (0, 0)),      # vertical taps   (grid-invariant)
            x_spec,                                       # tb activation planes
        ],
        out_specs=pl.BlockSpec((tb, Ho, Wo), lambda g: (g, 0, 0)),
        compiler_params=pltpu.CompilerParams(
            dimension_semantics=("parallel",),
            vmem_limit_bytes=vmem_limit),
    )(bt_h, a_v, x_in)

    return out3.reshape(N, C, Ho, Wo)                     # free reshape back to NCHW


def blur_reference(x, kernel2d, pad):
    """Pure numpy reference mirroring upfirdn2d_native (up=1, down=1)."""
    x = np.asarray(x, dtype=np.float32)
    k = np.asarray(kernel2d, dtype=np.float32)
    kh, kw = k.shape
    p0, p1 = pad
    xp = np.pad(x, ((0, 0), (0, 0), (p0, p1), (p0, p1)))
    Ho = xp.shape[2] - kh + 1
    Wo = xp.shape[3] - kw + 1
    kf = k[::-1, ::-1]
    out = np.zeros((x.shape[0], x.shape[1], Ho, Wo), np.float32)
    for i in range(Ho):
        for j in range(Wo):
            out[:, :, i, j] = np.einsum(
                'nchw,hw->nc', xp[:, :, i:i + kh, j:j + kw], kf)
    return out


if __name__ == "__main__":
    # Deterministic setup matching Blur(kernel=[1, 3, 3, 1], pad=(2, 1)).
    blur_taps_1d = [1, 3, 3, 1]
    pad = (2, 1)
    key = jax.random.PRNGKey(0)

    # 1) f32, H % 8 == 0 -> fused-horizontal path, 2 grid steps of 4 planes.
    x = jax.random.normal(key, (2, 4, 16, 16), dtype=jnp.float32)
    out = jax.block_until_ready(blur_pallas(x, blur_taps_1d, pad))
    ref = blur_reference(np.asarray(x), make_kernel(blur_taps_1d), pad)
    assert out.shape == ref.shape, (out.shape, ref.shape)
    np.testing.assert_allclose(np.asarray(out), ref, rtol=1e-4, atol=1e-4)

    # 2) bf16 activations -> bf16 MXU operands with f32 accumulation.
    x_bf = x.astype(jnp.bfloat16)
    out_bf = jax.block_until_ready(blur_pallas(x_bf, blur_taps_1d, pad))
    ref_bf = blur_reference(np.asarray(x_bf.astype(jnp.float32)),
                            make_kernel(blur_taps_1d), pad)
    np.testing.assert_allclose(np.asarray(out_bf.astype(jnp.float32)), ref_bf,
                               rtol=5e-2, atol=5e-2)

    # 3) H not a multiple of 8 -> per-plane (3-D block) fallback path.
    x_odd = jax.random.normal(jax.random.PRNGKey(0), (1, 2, 12, 12), dtype=jnp.float32)
    out_odd = jax.block_until_ready(blur_pallas(x_odd, blur_taps_1d, pad))
    ref_odd = blur_reference(np.asarray(x_odd), make_kernel(blur_taps_1d), pad)
    np.testing.assert_allclose(np.asarray(out_odd), ref_odd, rtol=1e-4, atol=1e-4)

    print("KERNEL_OK")
</pallas_src>

<mosaic_0001>
module attributes {stable_mosaic.version = 11 : i64} {
  func.func @kernel_body(%arg0: i32, %arg1: memref<16x16xf32, #tpu.memory_space<vmem>>, %arg2: memref<16x16xf32, #tpu.memory_space<vmem>>, %arg3: memref<64x16xf32, #tpu.memory_space<vmem>>, %arg4: memref<4x16x16xf32, #tpu.memory_space<vmem>>) attributes {dimension_semantics = [#tpu.dimension_semantics<parallel>], iteration_bounds = array<i64: 2>, scalar_prefetch = 0 : i64, scratch_operands = 0 : i64, tpu.core_type = #tpu.core_type<tc>, window_params = [{pipeline_mode = #tpu.pipeline_mode<synchronous>, transform_indices = @transform_0, window_bounds = array<i64: 16, 16>}, {pipeline_mode = #tpu.pipeline_mode<synchronous>, transform_indices = @transform_1, window_bounds = array<i64: 16, 16>}, {transform_indices = @transform_2, window_bounds = array<i64: 64, 16>}, {transform_indices = @transform_3, window_bounds = array<i64: 4, 16, 16>}]} {
    %c0 = arith.constant 0 : index
    %c0_0 = arith.constant 0 : index
    %0 = vector.load %arg1[%c0, %c0_0] : memref<16x16xf32, #tpu.memory_space<vmem>>, vector<16x16xf32>
    %c0_1 = arith.constant 0 : index
    %c0_2 = arith.constant 0 : index
    %1 = vector.load %arg2[%c0_1, %c0_2] : memref<16x16xf32, #tpu.memory_space<vmem>>, vector<16x16xf32>
    %c0_3 = arith.constant 0 : index
    %c0_4 = arith.constant 0 : index
    %2 = vector.load %arg3[%c0_3, %c0_4] : memref<64x16xf32, #tpu.memory_space<vmem>>, vector<64x16xf32>
    %cst = arith.constant dense<0.000000e+00> : vector<64x16xf32>
    %3 = tpu.matmul %2, %0, %cst {dimension_numbers = #tpu.dot_dimension_numbers<[1], [0], [0], [1], [0, 0, 1, 1], [], []>} : vector<64x16xf32>, vector<16x16xf32>, vector<64x16xf32> -> vector<64x16xf32>
    %4 = vector.extract_strided_slice %3 {offsets = [0, 0], sizes = [16, 16], strides = [1, 1]} : vector<64x16xf32> to vector<16x16xf32>
    %cst_5 = arith.constant dense<0.000000e+00> : vector<16x16xf32>
    %5 = tpu.matmul %1, %4, %cst_5 {dimension_numbers = #tpu.dot_dimension_numbers<[1], [0], [0], [1], [0, 0, 1, 1], [], []>} : vector<16x16xf32>, vector<16x16xf32>, vector<16x16xf32> -> vector<16x16xf32>
    %c0_6 = arith.constant 0 : index
    %c0_7 = arith.constant 0 : index
    %c0_8 = arith.constant 0 : index
    %6 = vector.load %arg4[%c0_6, %c0_7, %c0_8] : memref<4x16x16xf32, #tpu.memory_space<vmem>>, vector<1x16x16xf32>
    %7 = vector.shape_cast %6 : vector<1x16x16xf32> to vector<16x16xf32>
    %8 = vector.shape_cast %5 : vector<16x16xf32> to vector<1x16x16xf32>
    tpu.vector_store %arg4[%c0_6, %c0_7, %c0_8], %8 {strides = array<i32>} : memref<4x16x16xf32, #tpu.memory_space<vmem>>, vector<1x16x16xf32>,
    %9 = vector.extract_strided_slice %3 {offsets = [16, 0], sizes = [16, 16], strides = [1, 1]} : vector<64x16xf32> to vector<16x16xf32>
    %cst_9 = arith.constant dense<0.000000e+00> : vector<16x16xf32>
    %10 = tpu.matmul %1, %9, %cst_9 {dimension_numbers = #tpu.dot_dimension_numbers<[1], [0], [0], [1], [0, 0, 1, 1], [], []>} : vector<16x16xf32>, vector<16x16xf32>, vector<16x16xf32> -> vector<16x16xf32>
    %c1 = arith.constant 1 : index
    %c0_10 = arith.constant 0 : index
    %c0_11 = arith.constant 0 : index
    %11 = vector.load %arg4[%c1, %c0_10, %c0_11] : memref<4x16x16xf32, #tpu.memory_space<vmem>>, vector<1x16x16xf32>
    %12 = vector.shape_cast %11 : vector<1x16x16xf32> to vector<16x16xf32>
    %13 = vector.shape_cast %10 : vector<16x16xf32> to vector<1x16x16xf32>
    tpu.vector_store %arg4[%c1, %c0_10, %c0_11], %13 {strides = array<i32>} : memref<4x16x16xf32, #tpu.memory_space<vmem>>, vector<1x16x16xf32>,
    %14 = vector.extract_strided_slice %3 {offsets = [32, 0], sizes = [16, 16], strides = [1, 1]} : vector<64x16xf32> to vector<16x16xf32>
    %cst_12 = arith.constant dense<0.000000e+00> : vector<16x16xf32>
    %15 = tpu.matmul %1, %14, %cst_12 {dimension_numbers = #tpu.dot_dimension_numbers<[1], [0], [0], [1], [0, 0, 1, 1], [], []>} : vector<16x16xf32>, vector<16x16xf32>, vector<16x16xf32> -> vector<16x16xf32>
    %c2 = arith.constant 2 : index
    %c0_13 = arith.constant 0 : index
    %c0_14 = arith.constant 0 : index
    %16 = vector.load %arg4[%c2, %c0_13, %c0_14] : memref<4x16x16xf32, #tpu.memory_space<vmem>>, vector<1x16x16xf32>
    %17 = vector.shape_cast %16 : vector<1x16x16xf32> to vector<16x16xf32>
    %18 = vector.shape_cast %15 : vector<16x16xf32> to vector<1x16x16xf32>
    tpu.vector_store %arg4[%c2, %c0_13, %c0_14], %18 {strides = array<i32>} : memref<4x16x16xf32, #tpu.memory_space<vmem>>, vector<1x16x16xf32>,
    %19 = vector.extract_strided_slice %3 {offsets = [48, 0], sizes = [16, 16], strides = [1, 1]} : vector<64x16xf32> to vector<16x16xf32>
    %cst_15 = arith.constant dense<0.000000e+00> : vector<16x16xf32>
    %20 = tpu.matmul %1, %19, %cst_15 {dimension_numbers = #tpu.dot_dimension_numbers<[1], [0], [0], [1], [0, 0, 1, 1], [], []>} : vector<16x16xf32>, vector<16x16xf32>, vector<16x16xf32> -> vector<16x16xf32>
    %c3 = arith.constant 3 : index
    %c0_16 = arith.constant 0 : index
    %c0_17 = arith.constant 0 : index
    %21 = vector.load %arg4[%c3, %c0_16, %c0_17] : memref<4x16x16xf32, #tpu.memory_space<vmem>>, vector<1x16x16xf32>
    %22 = vector.shape_cast %21 : vector<1x16x16xf32> to vector<16x16xf32>
    %23 = vector.shape_cast %20 : vector<16x16xf32> to vector<1x16x16xf32>
    tpu.vector_store %arg4[%c3, %c0_16, %c0_17], %23 {strides = array<i32>} : memref<4x16x16xf32, #tpu.memory_space<vmem>>, vector<1x16x16xf32>,
    return
  }
  func.func @transform_0(%arg0: i32) -> (i32, i32) {
    %c0_i32 = arith.constant 0 : i32
    %c0_i32_0 = arith.constant 0 : i32
    %c0_i32_1 = arith.constant 0 : i32
    return %c0_i32, %c0_i32_0 : i32, i32
  }
  func.func @transform_1(%arg0: i32) -> (i32, i32) {
    %c0_i32 = arith.constant 0 : i32
    %c0_i32_0 = arith.constant 0 : i32
    %c0_i32_1 = arith.constant 0 : i32
    return %c0_i32, %c0_i32_0 : i32, i32
  }
  func.func @transform_2(%arg0: i32) -> (i32, i32) {
    %c0_i32 = arith.constant 0 : i32
    %c0_i32_0 = arith.constant 0 : i32
    return %arg0, %c0_i32 : i32, i32
  }
  func.func @transform_3(%arg0: i32) -> (i32, i32, i32) {
    %c0_i32 = arith.constant 0 : i32
    %c0_i32_0 = arith.constant 0 : i32
    %c0_i32_1 = arith.constant 0 : i32
    return %arg0, %c0_i32, %c0_i32_0 : i32, i32, i32
  }
}

</mosaic_0001>

<bundles_post_ra>
// kernel: tpu_custom_call.1
= control target key start
LH: loop header
LB: loop body
LE: loop exit
PB: predicated region body
PF: predicated region fallthrough
CT: control target
= control target key end

     0   :  { %8 = vsyncpa [#allocation3], 0  ;;  %s1078_s0 = inlined_call_operand.vmem [shape: f32[16,16], index: 0, kind: input, shape index: {}]   ;;  %s1079_s1 = inlined_call_operand.vmem [shape: f32[16,16], index: 1, kind: input, shape index: {}]   ;;  %s1080_s2 = inlined_call_operand.vmem [shape: f32[128,16], index: 2, kind: input, shape index: {}]   ;;  %s1081_s3 = inlined_call_operand.hbm [shape: f32[8,16,16], index: 3, kind: output, shape index: {}]  }
   0x1   :  { %10 = vsyncpa [#allocation3 + $0x1], 0  ;;  %s941_s12 = smov 0   ;;  %s943_s13 = smov 0  }
   0x2   :  { %s945_s14 = smov 0   ;;  %s947_s15 = smov 0  }
   0x3 LB: > { %s962_s16 = sadd.s32 4294967295, %s916_s15   ;;  %s708_s17 = sadd.s32 4294967294, %s916_s15   ;;  %s916_s15 = sphi %s947_s15, %s1087_s15   ;;  %s912_s14 = sphi %s945_s14, %s1086_s14   ;;  %s908_s13 = sphi %s943_s13, %s1085_s13   ;;  %s904_s12 = sphi %s941_s12, %s1084_s12  }
   0x4   : > { %s966_s18 = sadd.s32 1, %s916_s15   ;;  %s91_s19 = sadd.s32 1, %s912_s14 }
   0x5   : > { %s88_s20 = ssub.s32 %s916_s15, %s966_s18  ;;  %p101_p0 = scmp.ne.s32.totalorder %s912_s14, %s908_s13 }
   0x6   : > { %p89_p1 = scmp.eq.s32.totalorder %s88_s20, 0  ;;  %p102_p2 = scmp.eq.s32.totalorder %s962_s16, 1 }
   0x7   : > { %p107_p3 = scmp.ne.s32.totalorder %s908_s13, %s904_s12  ;;  %p108_p4 = scmp.eq.s32.totalorder %s708_s17, 1 }
   0x8   : > { %s977_s21 = scalar_select %p89_p1, %s912_s14, %s91_s19  }
   0x9   : > { %p979_p5 = por %p102_p2, %p101_p0  ;;  %p983_p6 = por %p108_p4, %p107_p3 }
   0xa   : > { %p711_p7 = scmp.ge.s32.totalorder %s916_s15, 1  ;;  %p141_p8 = scmp.lt.s32.totalorder %s916_s15, 3 }
   0xc   : > { %p142_p9 = pnand %p711_p7, %p141_p8 }
   0xd   : > { %s713_s28 = sshll.u32 (!%p142_p9), %s962_s16, 3  ;;  %s162_s10 = sand.u32 (!%p142_p9), 1, %s908_s13  }
   0xe   : > { %145 = sbr.rel (%p142_p9) target bundleno = 442 (0x1ba), region = 32  ;;  %p166_p10 = scmp.lt.s32.totalorder (!%p142_p9), %s713_s28, 15 }
   0xf   : > { %s712_s11 = sshll.u32 (!%p142_p9), %s162_s10, 6  ;;  %s744_s19 = sshll.u32 (!%p142_p9), %s962_s16, 10 }
  0x10   : > { %s164_s17 = scalar_lea.vmem (!%p142_p9), [#allocation2], %s712_s11  ;;  %s1032_s26 = scalar_lea.hbm (!%p142_p9), %s1081_s3, %s744_s19 }
  0x11   : > { %s646_s20 = sshll.u32 (!%p142_p9), %s164_s17, 4  ;;  %s1038_s16 = scalar_lea.sflag (!%p142_p9), [#allocation3], %s162_s10  ;;  %s1034_s20 = int_to_ptr.vmem [resolvable:$true] %s646_s20 }
  0x12   : > { %s856_s27 = scalar_lea.vmem (!%p142_p9), %s1034_s20, 1024 }
  0x13   : > { %v173_v0 = vld [vmem:[%s1078_s0 + $0x8] sm:$0xff]  ;;  %v172_v1 = vld [vmem:[%s1078_s0] sm:$0xff]  ;;  %s1089_s28 = smov (!%p166_p10, %s713_s28), 15  ;;  %vm184_vm0 = vcmask 130048   ;;  %p857_p11 = scmp.ne.s32.totalorder %s1034_s20, %s856_s27 }
  0x14   : > { %771 = vmatprep.subr.mxu0 %v173_v0  ;;  %s714_s29 = sshll.u32 %s1089_s28, 3  ;;  %v174_v10 = vld [vmem:[%s1079_s1] sm:$0xff]  ;;  %v175_v13 = vld [vmem:[%s1079_s1 + $0x8] sm:$0xff]  ;;  %s918_s28 = smov [#allocation2]  }
  0x15   : > { %772 = vmatpush3.msra.mxu0 %v173_v0  ;;  %s169_s5 = scalar_lea.vmem %s1080_s2, %s714_s29  ;;  %791 = vmatprep.mubr.msk.f32.mxu1 %vm184_vm0, %v174_v10  ;;  %p858_p12 = pnand %p857_p11, %p979_p5 }
  0x16   : > { %773 = vmatprep.subr.mxu0 %v172_v1  ;;  %v176_v2 = vld [vmem:[%s169_s5] sm:$0xff]  ;;  %v177_v3 = vld [vmem:[%s169_s5 + $0x8] sm:$0xff]  ;;  %v178_v4 = vld [vmem:[%s169_s5 + $0x10] sm:$0xff]  ;;  %s860_s29 = sshll.u32 %s918_s28, 4  ;;  %s861_s29 = int_to_ptr.vmem [resolvable:$false] %s860_s29 }
  0x17   : > { %774 = vmatpush3.msra.mxu0 %v172_v1  ;;  %775 = vmatprep.mubr.msk.f32.mxu0 %vm184_vm0, %v176_v2  ;;  %v179_v5 = vld [vmem:[%s169_s5 + $0x18] sm:$0xff]  ;;  %v180_v6 = vld [vmem:[%s169_s5 + $0x20] sm:$0xff]  ;;  %v181_v7 = vld [vmem:[%s169_s5 + $0x28] sm:$0xff]  ;;  %p859_p13 = pneg %p858_p12  ;;  %s862_s30 = scalar_lea.vmem %s861_s29, 2048 }
  0x18   : > { %776 = vmatmul.mubr.msk.f32.vlgmr.msra.gmra.mxu0 %vm184_vm0, %v177_v3  ;;  %v182_v8 = vld [vmem:[%s169_s5 + $0x30] sm:$0xff]  ;;  %v183_v9 = vld [vmem:[%s169_s5 + $0x38] sm:$0xff]  ;;  %p863_p0 = scmp.lt.s32.totalorder %s1034_s20, %s861_s29  ;;  %p864_p1 = scmp.lt.s32.totalorder %s862_s30, %s856_s27 }
  0x19   : > { %778 = vmatprep.mubr.msk.f32.mxu0 %vm184_vm0, %v178_v4 }
  0x1a   : > { %p865_p2 = por %p864_p1, %p863_p0 }
  0x1c   : > { %779 = vmatmul.mubr.msk.f32.gmra.mxu0 %vm184_vm0, %v179_v5  ;;  %p866_p3 = pnand %p865_p2, %p859_p13 }
  0x1d   : > { %781 = vmatprep.mubr.msk.f32.mxu0 %vm184_vm0, %v180_v6 }
  0x20   : > { %782 = vmatmul.mubr.msk.f32.gmra.mxu0 %vm184_vm0, %v181_v7 }
  0x21   : > { %784 = vmatprep.mubr.msk.f32.mxu0 %vm184_vm0, %v182_v8 }
  0x24   : > { %785 = vmatmul.mubr.msk.f32.gmra.mxu0 %vm184_vm0, %v183_v9 }
  0xd8   : > { %v777_v11 = vpop.f32.mrf.mxu0 }
  0xd9   : > { %787 = vmatprep.subr.mxu1 %v777_v11 }
  0xda   : > { %v275_v12 = vpop.f32.mrf.mxu0  ;;  %788 = vmatpush3.msra.mxu1 %v777_v11 }
  0xdb   : > { %789 = vmatprep.subr.mxu1 %v275_v12 }
  0xdc   : > { %v780_v14 = vpop.f32.mrf.mxu0  ;;  %790 = vmatpush3.msra.mxu1 %v275_v12 }
  0xdd   : > { %792 = vmatmul.mubr.msk.f32.vlgmr.msra.gmra.mxu1 %vm184_vm0, %v175_v13  ;;  %794 = vmatprep.subr.mxu1 %v780_v14 }
  0xde   : > { %v285_v15 = vpop.f32.mrf.mxu0  ;;  %795 = vmatpush3.msra.mxu1 %v780_v14  ;;  %798 = vmatprep.mubr.msk.f32.mxu1 %vm184_vm0, %v174_v10 }
  0xdf   : > { %796 = vmatprep.subr.mxu1 %v285_v15 }
  0xe0   : > { %v783_v16 = vpop.f32.mrf.mxu0  ;;  %797 = vmatpush3.msra.mxu1 %v285_v15 }
  0xe1   : > { %799 = vmatmul.mubr.msk.f32.vlgmr.msra.gmra.mxu1 %vm184_vm0, %v175_v13  ;;  %801 = vmatprep.subr.mxu1 %v783_v16 }
  0xe2   : > { %v295_v17 = vpop.f32.mrf.mxu0  ;;  %802 = vmatpush3.msra.mxu1 %v783_v16  ;;  %805 = vmatprep.mubr.msk.f32.mxu1 %vm184_vm0, %v174_v10 }
  0xe3   : > { %803 = vmatprep.subr.mxu1 %v295_v17 }
  0xe4   : > { %v786_v18 = vpop.f32.mrf.mxu0  ;;  %804 = vmatpush3.msra.mxu1 %v295_v17 }
  0xe5   : > { %806 = vmatmul.mubr.msk.f32.vlgmr.msra.gmra.mxu1 %vm184_vm0, %v175_v13  ;;  %808 = vmatprep.subr.mxu1 %v786_v18 }
  0xe6   : > { %v305_v19 = vpop.f32.mrf.mxu0  ;;  %809 = vmatpush3.msra.mxu1 %v786_v18  ;;  %812 = vmatprep.mubr.msk.f32.mxu1 %vm184_vm0, %v174_v10 }
  0xe7   : > { %810 = vmatprep.subr.mxu1 %v305_v19 }
  0xe8   : > { %811 = vmatpush3.msra.mxu1 %v305_v19 }
  0xe9   : > { %813 = vmatmul.mubr.msk.f32.vlgmr.msra.gmra.mxu1 %vm184_vm0, %v175_v13 }
 0x19d   : > { %v793_v20 = vpop.f32.mrf.mxu1 }
 0x19e   : > { %396 = vst.msk [vmem:[%s164_s17 + $0x8] sm:$0xff] %vm184_vm0, %v793_v20 }
 0x19f   : > { %v386_v21 = vpop.f32.mrf.mxu1 }
 0x1a0   : > { %395 = vst.msk [vmem:[%s164_s17] sm:$0xff] %vm184_vm0, %v386_v21 }
 0x1a1   : > { %v800_v22 = vpop.f32.mrf.mxu1 }
 0x1a2   : > { %728 = vst.msk [vmem:[%s164_s17 + $0x18] sm:$0xff] %vm184_vm0, %v800_v22 }
 0x1a3   : > { %v463_v23 = vpop.f32.mrf.mxu1 }
 0x1a4   : > { %727 = vst.msk [vmem:[%s164_s17 + $0x10] sm:$0xff] %vm184_vm0, %v463_v23 }
 0x1a5   : > { %v807_v24 = vpop.f32.mrf.mxu1 }
 0x1a6   : > { %732 = vst.msk [vmem:[%s164_s17 + $0x28] sm:$0xff] %vm184_vm0, %v807_v24 }
 0x1a7   : > { %v541_v25 = vpop.f32.mrf.mxu1 }
 0x1a8   : > { %731 = vst.msk [vmem:[%s164_s17 + $0x20] sm:$0xff] %vm184_vm0, %v541_v25 }
 0x1a9   : > { %v814_v26 = vpop.f32.mrf.mxu1 }
 0x1aa   : > { %736 = vst.msk [vmem:[%s164_s17 + $0x38] sm:$0xff] %vm184_vm0, %v814_v26 }
 0x1ab   : > { %v619_v27 = vpop.f32.mrf.mxu1 }
 0x1ac   : > { %735 = vst.msk [vmem:[%s164_s17 + $0x30] sm:$0xff] %vm184_vm0, %v619_v27 }
 0x1ad   : > { %869 = shalt.err (!%p866_p3)
}
 0x1ae   : > { %s870_s4 = scalar_lea.hbm %s1032_s26, 1024  ;;  %s874_s7 = scalar_lea.hbm %s1081_s3, 2048 }
 0x1af   : > { %p871_p4 = scmp.ne.s32.totalorder %s1032_s26, %s870_s4  ;;  %p875_p9 = scmp.lt.s32.totalorder %s1032_s26, %s1081_s3 }
 0x1b0   : > { %p876_p10 = scmp.lt.s32.totalorder %s874_s7, %s870_s4 }
 0x1b1   : > { %p872_p7 = pnand %p871_p4, %p979_p5 }
 0x1b2   : > { %p877_p11 = por %p876_p10, %p875_p9 }
 0x1b3   : > { %p873_p8 = pneg %p872_p7 }
 0x1b5   : > { %p878_p12 = pnand %p877_p11, %p873_p8 }
 0x1b7   : > { %881 = shalt.err (!%p878_p12)
}
 0x1b8   : > { %s919_s10 = smov 128   ;;  %s920_s11 = smov 8  }
 0x1b9   : > { %815 = dma.vmem_to_hbm [thread:$0]  (%p979_p5), %s1034_s20, 1024, %s1032_s26, %s1038_s16, %s919_s10, %s919_s10, %s920_s11  }
 0x1ba PF: > { %p821_p13 = scmp.ge.s32.totalorder %s916_s15, 2  ;;  %s661_s17 = sand.u32 1, %s904_s12  }
 0x1bb   : > { %s662_s19 = scalar_lea.sflag [#allocation3], %s661_s17 }
 0x1bc   : > { %p818_p0 = pnand %p821_p13, %p983_p6 }
 0x1be   : > { %p819_p1 = pneg %p818_p0 }
 0x1c0   : > { %899 = dma.done.wait (%p819_p1), %s662_s19, 1024  }
 0x1c1   : > { %901 = vsyncadd (%p819_p1), %s662_s19, 4294966272  ;;  %p13_p2 = scmp.ge.s32.totalorder %s966_s18, 4   ;;  %s1084_s12 = smov %s908_s13 }
 0x1c2   : > { %s1085_s13 = smov %s912_s14  ;;  %s1086_s14 = smov %s977_s21 }
 0x1c3   : > { %s1087_s15 = smov %s966_s18  ;;  %15 = sbr.rel (!%p13_p2) target bundleno = 3 (0x3), region = 70 }
 0x1c8   :  { %667 = vsyncpa [#allocation3], 1 }
 0x1c9   :  { %669 = vsyncpa [#allocation3 + $0x1], 1 }

</bundles_post_ra>
